<compile_context>
chip_gen: v5e
topology: v5e:2x2
jax: 0.10.0
libtpu: 0.0.40
codegen_flags: <defaults>
</compile_context>

<pallas_src>
import jax
import jax.numpy as jnp
from jax.experimental import pallas as pl
from jax.experimental.pallas import tpu as pltpu

# ---------------------------------------------------------------------------
# Problem sizes (small, consistent with the module's 4-input / 36-output API)
# ---------------------------------------------------------------------------
B = 2           # batch
C_IN = 4        # sweep_imgs channels
C_MAP = 4       # circle_map / ray_map channels
H = W = 16      # spatial
D_MLP = 8       # mlp_input feature dim
C_HID = 32      # hidden feature channels
NUM_HEADS = 36  # preds_1 .. preds_36
C_OUT = 2       # channels per prediction head

K_IN = C_IN + 2 * C_MAP           # 12 fused input channels
N_HEAD_COLS = NUM_HEADS * C_OUT   # 72 output channels (head-major)


# ---------------------------------------------------------------------------
# Pallas kernel: single grid step, fully fused, channel-major layout.
# Refs:
#   sweep  (B, 4, HW)   circle (B, 4, HW)   ray (B, 4, HW)
#   mlpT   (D_MLP, B)
#   w_inT  (C_HID, 12)  wmT (C_HID, D_MLP)  bmT (C_HID, 1)
#   whT    (72, C_HID)  bhT (72, 1)
#   out    (B, 72, HW)
# ---------------------------------------------------------------------------
def _engine_kernel(sweep_ref, circle_ref, ray_ref, mlpT_ref,
                   w_inT_ref, wmT_ref, bmT_ref, whT_ref, bhT_ref, out_ref):
    bsz = sweep_ref.shape[0]

    # SE-style gate for ALL batches in one tiny matmul (channels on sublanes):
    # (C_HID, D_MLP) @ (D_MLP, B) -> (C_HID, B)
    gateT = jax.nn.sigmoid(
        jnp.dot(wmT_ref[...], mlpT_ref[...], preferred_element_type=jnp.float32)
        + bmT_ref[...])

    w_inT = w_inT_ref[...]
    whT = whT_ref[...]
    bhT = bhT_ref[...]

    # Static (unrolled) loop over the tiny batch: everything stays 2-D with the
    # HW pixel axis on lanes (full-lane MXU passes, unmasked stores).
    for b in range(bsz):
        # Fused 1x1-conv input: stack 12 channel rows (sublane concat).
        xb = jnp.concatenate(
            [sweep_ref[b], circle_ref[b], ray_ref[b]], axis=0)       # (12, HW)
        featT = jnp.dot(w_inT, xb,
                        preferred_element_type=jnp.float32)          # (C_HID, HW)
        featT = jnp.maximum(featT, 0.0) * gateT[:, b:b + 1]          # ReLU + gate
        # 36 heads fused: (72, C_HID) @ (C_HID, HW) + (72, 1)
        out_ref[b] = (jnp.dot(whT, featT,
                              preferred_element_type=jnp.float32)
                      + bhT)


# ---------------------------------------------------------------------------
# Wrapper: jitted core returns the stacked (36, B, C_OUT, H, W) array.
# ---------------------------------------------------------------------------
@jax.jit
def _forward_stacked(sweep_imgs, mlp_input, circle_map, ray_map, params):
    w_inT, wmT, bmT, whT, bhT = params
    bsz, _, h, w = sweep_imgs.shape
    hw = h * w

    # NCHW is already channel-major per batch over flattened pixels: these are
    # pure reshapes (no transpose, no concat) -- the channel concat is in-kernel.
    sw = sweep_imgs.reshape(bsz, C_IN, hw)
    cm = circle_map.reshape(bsz, C_MAP, hw)
    rm = ray_map.reshape(bsz, C_MAP, hw)
    mlpT = mlp_input.T                                   # (D_MLP, B), tiny

    full = lambda s: pl.BlockSpec(s, lambda i: (0,) * len(s))

    out = pl.pallas_call(
        _engine_kernel,
        out_shape=jax.ShapeDtypeStruct((bsz, N_HEAD_COLS, hw), jnp.float32),
        grid=(1,),
        in_specs=[
            full(sw.shape), full(cm.shape), full(rm.shape), full(mlpT.shape),
            full(w_inT.shape), full(wmT.shape), full(bmT.shape),
            full(whT.shape), full(bhT.shape),
        ],
        out_specs=full((bsz, N_HEAD_COLS, hw)),
        compiler_params=pltpu.CompilerParams(
            dimension_semantics=("arbitrary",)),
    )(sw, cm, rm, mlpT, w_inT, wmT, bmT, whT, bhT)

    # (B, 72, HW) -> (36, B, C_OUT, H, W)   (glue, single transpose)
    out = out.reshape(bsz, NUM_HEADS, C_OUT, h, w)
    return jnp.transpose(out, (1, 0, 2, 3, 4))


def trt_module_forward(sweep_imgs, mlp_input, circle_map, ray_map, params):
    """Mirror TRTModule.forward: 4 inputs -> tuple of 36 NCHW float32 outputs.

    The 36-way tuple split is done OUTSIDE jit; downstream code that can
    consume the stacked (36, B, C_OUT, H, W) array should call
    `_forward_stacked` directly and skip this fan-out.
    """
    stacked = _forward_stacked(sweep_imgs, mlp_input, circle_map, ray_map, params)
    outputs = tuple(stacked[i] for i in range(NUM_HEADS))
    return outputs[0] if len(outputs) == 1 else outputs


def init_params(key):
    # Weights are generated directly in the pre-stacked / pre-transposed layout
    # the kernel consumes, so no per-forward-call pad/concat/transpose ops.
    ks = jax.random.split(key, 5)
    scale = 0.1
    w_inT = scale * jax.random.normal(ks[0], (C_HID, K_IN), jnp.float32)
    wmT = scale * jax.random.normal(ks[1], (C_HID, D_MLP), jnp.float32)
    bmT = scale * jax.random.normal(ks[2], (C_HID, 1), jnp.float32)
    whT = scale * jax.random.normal(ks[3], (N_HEAD_COLS, C_HID), jnp.float32)
    bhT = scale * jax.random.normal(ks[4], (N_HEAD_COLS, 1), jnp.float32)
    return (w_inT, wmT, bmT, whT, bhT)


if __name__ == "__main__":
    key = jax.random.PRNGKey(0)
    k_in, k_par = jax.random.split(key)
    k1, k2, k3, k4 = jax.random.split(k_in, 4)

    sweep_imgs = jax.random.normal(k1, (B, C_IN, H, W), jnp.float32)   # NCHW
    mlp_input = jax.random.normal(k2, (B, D_MLP), jnp.float32)
    circle_map = jax.random.normal(k3, (B, C_MAP, H, W), jnp.float32)  # NCHW
    ray_map = jax.random.normal(k4, (B, C_MAP, H, W), jnp.float32)     # NCHW

    params = init_params(k_par)

    outputs = trt_module_forward(sweep_imgs, mlp_input, circle_map, ray_map,
                                 params)
    jax.block_until_ready(outputs)

    assert isinstance(outputs, tuple) and len(outputs) == NUM_HEADS
    assert all(o.shape == (B, C_OUT, H, W) and o.dtype == jnp.float32
               for o in outputs)
    print("KERNEL_OK")
</pallas_src>

<mosaic_0001>
module attributes {stable_mosaic.version = 11 : i64} {
  func.func @_engine_kernel(%arg0: i32, %arg1: memref<2x4x256xf32, #tpu.memory_space<vmem>>, %arg2: memref<2x4x256xf32, #tpu.memory_space<vmem>>, %arg3: memref<2x4x256xf32, #tpu.memory_space<vmem>>, %arg4: memref<8x2xf32, #tpu.memory_space<vmem>>, %arg5: memref<32x12xf32, #tpu.memory_space<vmem>>, %arg6: memref<32x8xf32, #tpu.memory_space<vmem>>, %arg7: memref<32x1xf32, #tpu.memory_space<vmem>>, %arg8: memref<72x32xf32, #tpu.memory_space<vmem>>, %arg9: memref<72x1xf32, #tpu.memory_space<vmem>>, %arg10: memref<2x72x256xf32, #tpu.memory_space<vmem>>) attributes {dimension_semantics = [#tpu.dimension_semantics<arbitrary>], iteration_bounds = array<i64: 1>, scalar_prefetch = 0 : i64, scratch_operands = 0 : i64, tpu.core_type = #tpu.core_type<tc>, window_params = [{pipeline_mode = #tpu.pipeline_mode<synchronous>, transform_indices = @transform_0, window_bounds = array<i64: 2, 4, 256>}, {pipeline_mode = #tpu.pipeline_mode<synchronous>, transform_indices = @transform_1, window_bounds = array<i64: 2, 4, 256>}, {pipeline_mode = #tpu.pipeline_mode<synchronous>, transform_indices = @transform_2, window_bounds = array<i64: 2, 4, 256>}, {pipeline_mode = #tpu.pipeline_mode<synchronous>, transform_indices = @transform_3, window_bounds = array<i64: 8, 2>}, {pipeline_mode = #tpu.pipeline_mode<synchronous>, transform_indices = @transform_4, window_bounds = array<i64: 32, 12>}, {pipeline_mode = #tpu.pipeline_mode<synchronous>, transform_indices = @transform_5, window_bounds = array<i64: 32, 8>}, {pipeline_mode = #tpu.pipeline_mode<synchronous>, transform_indices = @transform_6, window_bounds = array<i64: 32, 1>}, {pipeline_mode = #tpu.pipeline_mode<synchronous>, transform_indices = @transform_7, window_bounds = array<i64: 72, 32>}, {pipeline_mode = #tpu.pipeline_mode<synchronous>, transform_indices = @transform_8, window_bounds = array<i64: 72, 1>}, {pipeline_mode = #tpu.pipeline_mode<synchronous>, transform_indices = @transform_9, window_bounds = array<i64: 2, 72, 256>}]} {
    %c0 = arith.constant 0 : index
    %c0_0 = arith.constant 0 : index
    %0 = vector.load %arg6[%c0, %c0_0] : memref<32x8xf32, #tpu.memory_space<vmem>>, vector<32x8xf32>
    %c0_1 = arith.constant 0 : index
    %c0_2 = arith.constant 0 : index
    %1 = vector.load %arg4[%c0_1, %c0_2] : memref<8x2xf32, #tpu.memory_space<vmem>>, vector<8x2xf32>
    %cst = arith.constant dense<0.000000e+00> : vector<32x2xf32>
    %2 = tpu.matmul %0, %1, %cst {dimension_numbers = #tpu.dot_dimension_numbers<[1], [0], [0], [1], [0, 0, 1, 1], [], []>} : vector<32x8xf32>, vector<8x2xf32>, vector<32x2xf32> -> vector<32x2xf32>
    %c0_3 = arith.constant 0 : index
    %c0_4 = arith.constant 0 : index
    %3 = vector.load %arg7[%c0_3, %c0_4] : memref<32x1xf32, #tpu.memory_space<vmem>>, vector<32x1xf32>
    %4 = vector.broadcast %3 : vector<32x1xf32> to vector<32x2xf32>
    %5 = arith.addf %2, %4 : vector<32x2xf32>
    %6 = arith.negf %5 : vector<32x2xf32>
    %7 = math.exp %6 : vector<32x2xf32>
    %cst_5 = arith.constant 1.000000e+00 : f32
    %8 = vector.broadcast %cst_5 : f32 to vector<32x2xf32>
    %9 = arith.addf %8, %7 : vector<32x2xf32>
    %10 = arith.divf %8, %9 : vector<32x2xf32>
    %c0_6 = arith.constant 0 : index
    %c0_7 = arith.constant 0 : index
    %11 = vector.load %arg5[%c0_6, %c0_7] : memref<32x12xf32, #tpu.memory_space<vmem>>, vector<32x12xf32>
    %c0_8 = arith.constant 0 : index
    %c0_9 = arith.constant 0 : index
    %12 = vector.load %arg8[%c0_8, %c0_9] : memref<72x32xf32, #tpu.memory_space<vmem>>, vector<72x32xf32>
    %c0_10 = arith.constant 0 : index
    %c0_11 = arith.constant 0 : index
    %13 = vector.load %arg9[%c0_10, %c0_11] : memref<72x1xf32, #tpu.memory_space<vmem>>, vector<72x1xf32>
    %c0_12 = arith.constant 0 : index
    %c0_13 = arith.constant 0 : index
    %c0_14 = arith.constant 0 : index
    %14 = vector.load %arg1[%c0_12, %c0_13, %c0_14] : memref<2x4x256xf32, #tpu.memory_space<vmem>>, vector<1x4x256xf32>
    %15 = vector.shape_cast %14 : vector<1x4x256xf32> to vector<4x256xf32>
    %c0_15 = arith.constant 0 : index
    %c0_16 = arith.constant 0 : index
    %c0_17 = arith.constant 0 : index
    %16 = vector.load %arg2[%c0_15, %c0_16, %c0_17] : memref<2x4x256xf32, #tpu.memory_space<vmem>>, vector<1x4x256xf32>
    %17 = vector.shape_cast %16 : vector<1x4x256xf32> to vector<4x256xf32>
    %c0_18 = arith.constant 0 : index
    %c0_19 = arith.constant 0 : index
    %c0_20 = arith.constant 0 : index
    %18 = vector.load %arg3[%c0_18, %c0_19, %c0_20] : memref<2x4x256xf32, #tpu.memory_space<vmem>>, vector<1x4x256xf32>
    %19 = vector.shape_cast %18 : vector<1x4x256xf32> to vector<4x256xf32>
    %20 = tpu.concatenate %15, %17, %19 in 0 : vector<4x256xf32>, vector<4x256xf32>, vector<4x256xf32> -> vector<12x256xf32>
    %cst_21 = arith.constant dense<0.000000e+00> : vector<32x256xf32>
    %21 = tpu.matmul %11, %20, %cst_21 {dimension_numbers = #tpu.dot_dimension_numbers<[1], [0], [0], [1], [0, 0, 1, 1], [], []>} : vector<32x12xf32>, vector<12x256xf32>, vector<32x256xf32> -> vector<32x256xf32>
    %cst_22 = arith.constant 0.000000e+00 : f32
    %22 = vector.broadcast %cst_22 : f32 to vector<32x256xf32>
    %23 = arith.maximumf %21, %22 : vector<32x256xf32>
    %24 = vector.extract_strided_slice %10 {offsets = [0, 0], sizes = [32, 1], strides = [1, 1]} : vector<32x2xf32> to vector<32x1xf32>
    %25 = vector.broadcast %24 : vector<32x1xf32> to vector<32x256xf32>
    %26 = arith.mulf %23, %25 : vector<32x256xf32>
    %cst_23 = arith.constant dense<0.000000e+00> : vector<72x256xf32>
    %27 = tpu.matmul %12, %26, %cst_23 {dimension_numbers = #tpu.dot_dimension_numbers<[1], [0], [0], [1], [0, 0, 1, 1], [], []>} : vector<72x32xf32>, vector<32x256xf32>, vector<72x256xf32> -> vector<72x256xf32>
    %28 = vector.broadcast %13 : vector<72x1xf32> to vector<72x256xf32>
    %29 = arith.addf %27, %28 : vector<72x256xf32>
    %c0_24 = arith.constant 0 : index
    %c0_25 = arith.constant 0 : index
    %c0_26 = arith.constant 0 : index
    %30 = vector.load %arg10[%c0_24, %c0_25, %c0_26] : memref<2x72x256xf32, #tpu.memory_space<vmem>>, vector<1x72x256xf32>
    %31 = vector.shape_cast %30 : vector<1x72x256xf32> to vector<72x256xf32>
    %32 = vector.shape_cast %29 : vector<72x256xf32> to vector<1x72x256xf32>
    tpu.vector_store %arg10[%c0_24, %c0_25, %c0_26], %32 {strides = array<i32>} : memref<2x72x256xf32, #tpu.memory_space<vmem>>, vector<1x72x256xf32>,
    %c1 = arith.constant 1 : index
    %c0_27 = arith.constant 0 : index
    %c0_28 = arith.constant 0 : index
    %33 = vector.load %arg1[%c1, %c0_27, %c0_28] : memref<2x4x256xf32, #tpu.memory_space<vmem>>, vector<1x4x256xf32>
    %34 = vector.shape_cast %33 : vector<1x4x256xf32> to vector<4x256xf32>
    %c1_29 = arith.constant 1 : index
    %c0_30 = arith.constant 0 : index
    %c0_31 = arith.constant 0 : index
    %35 = vector.load %arg2[%c1_29, %c0_30, %c0_31] : memref<2x4x256xf32, #tpu.memory_space<vmem>>, vector<1x4x256xf32>
    %36 = vector.shape_cast %35 : vector<1x4x256xf32> to vector<4x256xf32>
    %c1_32 = arith.constant 1 : index
    %c0_33 = arith.constant 0 : index
    %c0_34 = arith.constant 0 : index
    %37 = vector.load %arg3[%c1_32, %c0_33, %c0_34] : memref<2x4x256xf32, #tpu.memory_space<vmem>>, vector<1x4x256xf32>
    %38 = vector.shape_cast %37 : vector<1x4x256xf32> to vector<4x256xf32>
    %39 = tpu.concatenate %34, %36, %38 in 0 : vector<4x256xf32>, vector<4x256xf32>, vector<4x256xf32> -> vector<12x256xf32>
    %cst_35 = arith.constant dense<0.000000e+00> : vector<32x256xf32>
    %40 = tpu.matmul %11, %39, %cst_35 {dimension_numbers = #tpu.dot_dimension_numbers<[1], [0], [0], [1], [0, 0, 1, 1], [], []>} : vector<32x12xf32>, vector<12x256xf32>, vector<32x256xf32> -> vector<32x256xf32>
    %cst_36 = arith.constant 0.000000e+00 : f32
    %41 = vector.broadcast %cst_36 : f32 to vector<32x256xf32>
    %42 = arith.maximumf %40, %41 : vector<32x256xf32>
    %43 = vector.extract_strided_slice %10 {offsets = [0, 1], sizes = [32, 1], strides = [1, 1]} : vector<32x2xf32> to vector<32x1xf32>
    %44 = vector.broadcast %43 : vector<32x1xf32> to vector<32x256xf32>
    %45 = arith.mulf %42, %44 : vector<32x256xf32>
    %cst_37 = arith.constant dense<0.000000e+00> : vector<72x256xf32>
    %46 = tpu.matmul %12, %45, %cst_37 {dimension_numbers = #tpu.dot_dimension_numbers<[1], [0], [0], [1], [0, 0, 1, 1], [], []>} : vector<72x32xf32>, vector<32x256xf32>, vector<72x256xf32> -> vector<72x256xf32>
    %47 = vector.broadcast %13 : vector<72x1xf32> to vector<72x256xf32>
    %48 = arith.addf %46, %47 : vector<72x256xf32>
    %c1_38 = arith.constant 1 : index
    %c0_39 = arith.constant 0 : index
    %c0_40 = arith.constant 0 : index
    %49 = vector.load %arg10[%c1_38, %c0_39, %c0_40] : memref<2x72x256xf32, #tpu.memory_space<vmem>>, vector<1x72x256xf32>
    %50 = vector.shape_cast %49 : vector<1x72x256xf32> to vector<72x256xf32>
    %51 = vector.shape_cast %48 : vector<72x256xf32> to vector<1x72x256xf32>
    tpu.vector_store %arg10[%c1_38, %c0_39, %c0_40], %51 {strides = array<i32>} : memref<2x72x256xf32, #tpu.memory_space<vmem>>, vector<1x72x256xf32>,
    return
  }
  func.func @transform_0(%arg0: i32) -> (i32, i32, i32) {
    %c0_i32 = arith.constant 0 : i32
    %c0_i32_0 = arith.constant 0 : i32
    %c0_i32_1 = arith.constant 0 : i32
    %c0_i32_2 = arith.constant 0 : i32
    return %c0_i32, %c0_i32_0, %c0_i32_1 : i32, i32, i32
  }
  func.func @transform_1(%arg0: i32) -> (i32, i32, i32) {
    %c0_i32 = arith.constant 0 : i32
    %c0_i32_0 = arith.constant 0 : i32
    %c0_i32_1 = arith.constant 0 : i32
    %c0_i32_2 = arith.constant 0 : i32
    return %c0_i32, %c0_i32_0, %c0_i32_1 : i32, i32, i32
  }
  func.func @transform_2(%arg0: i32) -> (i32, i32, i32) {
    %c0_i32 = arith.constant 0 : i32
    %c0_i32_0 = arith.constant 0 : i32
    %c0_i32_1 = arith.constant 0 : i32
    %c0_i32_2 = arith.constant 0 : i32
    return %c0_i32, %c0_i32_0, %c0_i32_1 : i32, i32, i32
  }
  func.func @transform_3(%arg0: i32) -> (i32, i32) {
    %c0_i32 = arith.constant 0 : i32
    %c0_i32_0 = arith.constant 0 : i32
    %c0_i32_1 = arith.constant 0 : i32
    return %c0_i32, %c0_i32_0 : i32, i32
  }
  func.func @transform_4(%arg0: i32) -> (i32, i32) {
    %c0_i32 = arith.constant 0 : i32
    %c0_i32_0 = arith.constant 0 : i32
    %c0_i32_1 = arith.constant 0 : i32
    return %c0_i32, %c0_i32_0 : i32, i32
  }
  func.func @transform_5(%arg0: i32) -> (i32, i32) {
    %c0_i32 = arith.constant 0 : i32
    %c0_i32_0 = arith.constant 0 : i32
    %c0_i32_1 = arith.constant 0 : i32
    return %c0_i32, %c0_i32_0 : i32, i32
  }
  func.func @transform_6(%arg0: i32) -> (i32, i32) {
    %c0_i32 = arith.constant 0 : i32
    %c0_i32_0 = arith.constant 0 : i32
    %c0_i32_1 = arith.constant 0 : i32
    return %c0_i32, %c0_i32_0 : i32, i32
  }
  func.func @transform_7(%arg0: i32) -> (i32, i32) {
    %c0_i32 = arith.constant 0 : i32
    %c0_i32_0 = arith.constant 0 : i32
    %c0_i32_1 = arith.constant 0 : i32
    return %c0_i32, %c0_i32_0 : i32, i32
  }
  func.func @transform_8(%arg0: i32) -> (i32, i32) {
    %c0_i32 = arith.constant 0 : i32
    %c0_i32_0 = arith.constant 0 : i32
    %c0_i32_1 = arith.constant 0 : i32
    return %c0_i32, %c0_i32_0 : i32, i32
  }
  func.func @transform_9(%arg0: i32) -> (i32, i32, i32) {
    %c0_i32 = arith.constant 0 : i32
    %c0_i32_0 = arith.constant 0 : i32
    %c0_i32_1 = arith.constant 0 : i32
    %c0_i32_2 = arith.constant 0 : i32
    return %c0_i32, %c0_i32_0, %c0_i32_1 : i32, i32, i32
  }
}

</mosaic_0001>

<bundles_post_ra>
// kernel: _forward_stacked.1
= control target key start
LH: loop header
LB: loop body
LE: loop exit
PB: predicated region body
PF: predicated region fallthrough
CT: control target
= control target key end

     0   :  { %v863_v0 = vmov 0   ;;  %vm61_vm0 = vcmask 64512   ;;  %vm221_vm1 = vcmask 1043456   ;;  %vm224_vm2 = vcmask 97280   ;;  %s1242_s6 = inlined_call_operand.vmem [shape: f32[32,1], index: 6, kind: input, shape index: {}]   ;;  %s1243_s3 = inlined_call_operand.vmem [shape: f32[8,2], index: 3, kind: input, shape index: {}]   ;;  %s1244_s5 = inlined_call_operand.vmem [shape: f32[32,8], index: 5, kind: input, shape index: {}]   ;;  %s1245_s0 = inlined_call_operand.vmem [shape: f32[2,4,256], index: 0, kind: input, shape index: {}]   ;;  %s1246_s1 = inlined_call_operand.vmem [shape: f32[2,4,256], index: 1, kind: input, shape index: {}]   ;;  %s1247_s2 = inlined_call_operand.vmem [shape: f32[2,4,256], index: 2, kind: input, shape index: {}]   ;;  %s1248_s4 = inlined_call_operand.vmem [shape: f32[32,12], index: 4, kind: input, shape index: {}]   ;;  %s1249_s8 = inlined_call_operand.vmem [shape: f32[72,1], index: 8, kind: input, shape index: {}]   ;;  %s1250_s7 = inlined_call_operand.vmem [shape: f32[72,32], index: 7, kind: input, shape index: {}]   ;;  %s1251_s9 = inlined_call_operand.vmem [shape: f32[2,72,256], index: 9, kind: output, shape index: {}]  }
   0x1   :  { %835 = vset.pattern.permute.xlu0 %v863_v0  ;;  %v40_v1 = vld [vmem:[%s1242_s6 + $0x18] sm:$0xff]  ;;  %v36_v2 = vld [vmem:[%s1243_s3] sm:$0xff]  ;;  %836 = vset.pattern.permute.xlu1 %v863_v0  ;;  %v34_v4 = vld [vmem:[%s1244_s5 + $0x10] sm:$0xff]  ;;  %v864_v38 = vmov 1  }
   0x2   :  { %v32_v3 = vld [vmem:[%s1244_s5] sm:$0xff]  ;;  %58 = vperm.xlu0 %835, %v40_v1   ;;  %89 = vmatpush.msra.mxu0 %v36_v2  ;;  %v35_v5 = vld [vmem:[%s1244_s5 + $0x18] sm:$0xff]  ;;  %v38_v6 = vld [vmem:[%s1242_s6 + $0x8] sm:$0xff] }
   0x3   :  { %829 = vmatpush.msra.mxu1 %v36_v2  ;;  %830 = vmatpush.msra.mxu3 %v36_v2  ;;  %v201_v7 = vld [vmem:[%s1245_s0] sm:$0xff]  ;;  %v39_v8 = vld [vmem:[%s1242_s6 + $0x10] sm:$0xff]  ;;  %v33_v9 = vld [vmem:[%s1244_s5 + $0x8] sm:$0xff] }
   0x4   :  { %744 = vmatmul.msk.f32.vlgmr.msra.gmra.mxu0 %vm61_vm0, %v32_v3  ;;  %746 = vmatmul.msk.f32.vlgmr.msra.gmra.mxu1 %vm61_vm0, %v34_v4  ;;  %205 = vst [vmem:[#allocation1] ss:$2 sm:$0xff] %v201_v7  ;;  %v37_v10 = vld [vmem:[%s1242_s6] sm:$0xff]  ;;  %v780_v17 = vld [vmem:[%s1245_s0 + $0x8] sm:$0xff]  ;;  %v182_v23 = vld [vmem:[%s1248_s4 + $0x18] sm:$0xff] }
   0x5   :  { %747 = vmatmul.msk.f32.vlgmr.msra.gmra.mxu3 %vm61_vm0, %v35_v5  ;;  %48 = vperm.xlu1 %836, %v38_v6   ;;  %v202_v11 = vld [vmem:[%s1246_s1] sm:$0xff]  ;;  %v781_v24 = vld [vmem:[%s1246_s1 + $0x8] sm:$0xff]  ;;  %v181_v31 = vld [vmem:[%s1248_s4 + $0x10] sm:$0xff] }
   0x6   :  { %838 = vset.pattern.permute.xlu2 %v863_v0  ;;  %v203_v14 = vld [vmem:[%s1247_s2] sm:$0xff]  ;;  %v180_v27 = vld [vmem:[%s1248_s4 + $0x8] sm:$0xff] }
   0x7   :  { %v179_v22 = vld [vmem:[%s1248_s4] sm:$0xff]  ;;  %v782_v28 = vld [vmem:[%s1247_s2 + $0x8] sm:$0xff] }
   0xa   :  { %53 = vperm.xlu0 %835, %v39_v8  }
   0xb   :  { %v206_v12 = vld.sshfl [vmem:[#allocation1] sm:$0xff pattern:$0x75316420]  ;;  %v207_v13 = vld.sshfl [vmem:[#allocation1 + $0x8] sm:$0xff pattern:$0x75316420] }
   0xc   :  { %745 = vmatmul.msk.f32.gmra.mxu0 %vm61_vm0, %v33_v9  ;;  %212 = vst [vmem:[#allocation1 + $0x1] ss:$2 sm:$0xff] %v202_v11 }
   0xd   :  { %43 = vperm.xlu1 %836, %v37_v10  }
  0x13   :  { %v213_v15 = vld.sshfl [vmem:[#allocation1] sm:$0xff pattern:$0x75316420]  ;;  %v214_v16 = vld.sshfl [vmem:[#allocation1 + $0x8] sm:$0xff pattern:$0x75316420] }
  0x14   :  { %218 = vst [vmem:[#allocation1] ss:$2 sm:$0xff] %v203_v14  ;;  %v222_v20 = vsel %vm221_vm1, %v206_v12, %v213_v15  ;;  %v223_v21 = vsel %vm221_vm1, %v207_v13, %v214_v16 }
  0x15   :  { %837 = vset.pattern.permute.xlu1 %v864_v38 }
  0x1b   :  { %v219_v18 = vld.sshfl [vmem:[#allocation1] sm:$0xff pattern:$0x75316420]  ;;  %v220_v19 = vld.sshfl [vmem:[#allocation1 + $0x8] sm:$0xff pattern:$0x75316420] }
  0x1c   :  { %752 = vmatpush.msk.msrb.mxu3 %vm221_vm1, %v219_v18  ;;  %831 = vmatpush.msk.msra.mxu2 %vm221_vm1, %v220_v19  ;;  %521 = vst [vmem:[#allocation1] ss:$2 sm:$0xff] %v780_v17 }
  0x1d   :  { %757 = vmatpush.msk.msrb.mxu0 %vm221_vm1, %v220_v19 }
  0x1e   :  { %256 = vmatpush.msrb.mxu3 %v222_v20  ;;  %832 = vmatpush.msra.mxu2 %v223_v21 }
  0x1f   :  { %753 = vmatmul.msk.f32.vlgmr.msrb.gmra.mxu3 %vm224_vm2, %v179_v22  ;;  %761 = vmatmul.msk.f32.vlgmr.msra.gmra.mxu2 %vm224_vm2, %v182_v23 }
  0x20   :  { %285 = vmatpush.msrb.mxu0 %v223_v21 }
  0x21   :  { %758 = vmatmul.msk.f32.vlgmr.msrb.gmra.mxu0 %vm224_vm2, %v179_v22 }
  0x23   :  { %v522_v25 = vld.sshfl [vmem:[#allocation1] sm:$0xff pattern:$0x75316420]  ;;  %v523_v26 = vld.sshfl [vmem:[#allocation1 + $0x8] sm:$0xff pattern:$0x75316420] }
  0x24   :  { %528 = vst [vmem:[#allocation1 + $0x1] ss:$2 sm:$0xff] %v781_v24 }
  0x27   :  { %754 = vmatmul.msk.f32.gmra.mxu3 %vm224_vm2, %v180_v27 }
  0x29   :  { %759 = vmatmul.msk.f32.gmra.mxu0 %vm224_vm2, %v180_v27 }
  0x2b   :  { %v529_v29 = vld.sshfl [vmem:[#allocation1] sm:$0xff pattern:$0x75316420]  ;;  %v530_v30 = vld.sshfl [vmem:[#allocation1 + $0x8] sm:$0xff pattern:$0x75316420] }
  0x2c   :  { %534 = vst [vmem:[#allocation1] ss:$2 sm:$0xff] %v782_v28  ;;  %v538_v33 = vsel %vm221_vm1, %v523_v26, %v530_v30  ;;  %v537_v35 = vsel %vm221_vm1, %v522_v25, %v529_v29 }
  0x2f   :  { %755 = vmatmul.msk.f32.gmra.mxu3 %vm224_vm2, %v181_v31 }
  0x31   :  { %760 = vmatmul.msk.f32.gmra.mxu0 %vm224_vm2, %v181_v31 }
  0x33   :  { %v536_v32 = vld.sshfl [vmem:[#allocation1 + $0x8] sm:$0xff pattern:$0x75316420]  ;;  %v535_v34 = vld.sshfl [vmem:[#allocation1] sm:$0xff pattern:$0x75316420] }
  0x34   :  { %788 = vmatpush.msk.msrb.mxu2 %vm221_vm1, %v536_v32  ;;  %783 = vmatpush.msk.msrb.mxu1 %vm221_vm1, %v535_v34 }
  0x36   :  { %587 = vmatpush.msrb.mxu2 %v538_v33  ;;  %558 = vmatpush.msrb.mxu1 %v537_v35 }
  0x37   :  { %789 = vmatmul.msk.f32.vlgmr.msrb.gmra.mxu2 %vm224_vm2, %v179_v22  ;;  %784 = vmatmul.msk.f32.vlgmr.msrb.gmra.mxu1 %vm224_vm2, %v179_v22 }
  0x38   :  { %756 = vmatmul.msk.f32.gmra.mxu3 %vm224_vm2, %v182_v23 }
  0x3f   :  { %790 = vmatmul.msk.f32.gmra.mxu2 %vm224_vm2, %v180_v27  ;;  %785 = vmatmul.msk.f32.gmra.mxu1 %vm224_vm2, %v180_v27 }
  0x47   :  { %791 = vmatmul.msk.f32.gmra.mxu2 %vm224_vm2, %v181_v31  ;;  %786 = vmatmul.msk.f32.gmra.mxu1 %vm224_vm2, %v181_v31 }
  0x4f   :  { %792 = vmatmul.msk.f32.gmra.mxu2 %vm224_vm2, %v182_v23  ;;  %787 = vmatmul.msk.f32.gmra.mxu1 %vm224_vm2, %v182_v23 }
  0x74   :  { %v59_v36 = vpop.permute.xlu0 %58 }
  0x77   :  { %v49_v37 = vpop.permute.xlu1 %48 }
  0x7c   :  { %v54_v40 = vpop.permute.xlu0 %53 }
  0x7f   :  { %v44_v39 = vpop.permute.xlu1 %43 }
  0x81   :  { %v91_v41 = vpop.f32.mrf.mxu0  ;;  %v97_v42 = vpop.f32.mrf.mxu1 }
  0x82   :  { %v92_v43 = vadd.f32 %v91_v41, %v44_v39  ;;  %v98_v44 = vadd.f32 %v97_v42, %v54_v40  ;;  %v192_v40 = vld [vmem:[%s1249_s8] sm:$0xff]  ;;  %v195_v41 = vld [vmem:[%s1249_s8 + $0x18] sm:$0xff]  ;;  %v197_v42 = vld [vmem:[%s1249_s8 + $0x28] sm:$0xff] }
  0x84   :  { %v748_v45 = vmul.f32 -1.442695, %v92_v43  ;;  %v750_v46 = vmul.f32 -1.442695, %v98_v44  ;;  %v200_v43 = vld [vmem:[%s1249_s8 + $0x40] sm:$0xff] }
  0x86   :  { %847 = vpow2.f32 %v748_v45 }
  0x87   :  { %849 = vpow2.f32 %v750_v46 }
  0x88   :  { %v100_v47 = vpop.f32.mrf.mxu3 }
  0x89   :  { %v101_v48 = vadd.f32 %v100_v47, %v59_v36  ;;  %v94_v49 = vpop.f32.mrf.mxu0 }
  0x8a   :  { %v95_v50 = vadd.f32 %v94_v49, %v49_v37 }
  0x8b   :  { %v751_v51 = vmul.f32 -1.442695, %v101_v48 }
  0x8c   :  { %v848_v52 = vpop.eup %847  ;;  %v749_v53 = vmul.f32 -1.442695, %v95_v50 }
  0x8d   :  { %v850_v54 = vpop.eup %849  ;;  %v1005_v55 = vadd.f32 1.0, %v848_v52  ;;  %851 = vpow2.f32 %v751_v51 }
  0x8e   :  { %v117_v56 = vadd.f32 1.0, %v850_v54  ;;  %853 = vpow2.f32 %v749_v53 }
  0x8f   :  { %855 = vrcp.f32 %v1005_v55  ;;  %vm124_vm7 = vweird.f32 %v1005_v55  ;;  %v130_v27 = vand.u32 2147483648, %v1005_v55  ;;  %v128_v30 = vand.u32 2147483647, %v1005_v55 }
  0x90   :  { %857 = vrcp.f32 %v117_v56  ;;  %v160_v3 = vand.u32 2147483648, %v117_v56  ;;  %v158_v5 = vand.u32 2147483647, %v117_v56  ;;  %vm154_vm4 = vweird.f32 %v117_v56 }
  0x91   :  { %v131_v37 = vor.u32 1.1754944e-38, %v130_v27  ;;  %vm129_vm2 = vcmp.eq.f32.partialorder %v128_v30, 8.507059e+37 }
  0x92   :  { %v161_v11 = vor.u32 1.1754944e-38, %v160_v3  ;;  %vm159_vm6 = vcmp.eq.f32.partialorder %v158_v5, 8.507059e+37 }
  0x93   :  { %v852_v57 = vpop.eup %851 }
  0x94   :  { %v854_v58 = vpop.eup %853  ;;  %v118_v59 = vadd.f32 1.0, %v852_v57 }
  0x95   :  { %v1008_v60 = vpop.eup %855  ;;  %v116_v61 = vadd.f32 1.0, %v854_v58 }
  0x96   :  { %v858_v62 = vpop.eup %857  ;;  %859 = vrcp.f32 %v118_v59  ;;  %v120_v2 = vmul.f32 %v1008_v60, %v1005_v55  ;;  %v175_v17 = vand.u32 2147483648, %v118_v59  ;;  %vm125_vm8 = vweird.f32 %v1008_v60 }
  0x97   :  { %861 = vrcp.f32 %v116_v61  ;;  %v150_v63 = vmul.f32 %v858_v62, %v117_v56  ;;  %vm155_vm3 = vweird.f32 %v858_v62  ;;  %v173_v20 = vand.u32 2147483647, %v118_v59  ;;  %vm1018_vm12 = vmor %vm124_vm7, %vm125_vm8 }
  0x98   :  { %v121_v6 = vsub.f32 1.0, %v120_v2  ;;  %vm156_vm5 = vmor %vm154_vm4, %vm155_vm3  ;;  %v145_v21 = vand.u32 2147483648, %v116_v61  ;;  %v143_v23 = vand.u32 2147483647, %v116_v61  ;;  %vm169_vm11 = vweird.f32 %v118_v59 }
  0x99   :  { %v151_v1 = vsub.f32 1.0, %v150_v63  ;;  %v176_v28 = vor.u32 1.1754944e-38, %v175_v17  ;;  %vm139_vm14 = vweird.f32 %v116_v61  ;;  %vm174_vm15 = vcmp.eq.f32.partialorder %v173_v20, 8.507059e+37 }
  0x9a   :  { %v122_v13 = vmul.f32 %v1008_v60, %v121_v6  ;;  %v146_v32 = vor.u32 1.1754944e-38, %v145_v21  ;;  %vm144_vm1 = vcmp.eq.f32.partialorder %v143_v23, 8.507059e+37  ;;  %vm380_vm3 = vcmask 261120  }
  0x9b   :  { %v152_v4 = vmul.f32 %v858_v62, %v151_v1 }
  0x9c   :  { %v860_v7 = vpop.eup %859  ;;  %v123_v24 = vadd.f32 %v1008_v60, %v122_v13 }
  0x9d   :  { %v862_v8 = vpop.eup %861  ;;  %v153_v9 = vadd.f32 %v858_v62, %v152_v4  ;;  %v165_v10 = vmul.f32 %v860_v7, %v118_v59  ;;  %vm170_vm9 = vweird.f32 %v860_v7 }
  0x9e   :  { %v135_v12 = vmul.f32 %v862_v8, %v116_v61  ;;  %vm140_vm10 = vweird.f32 %v862_v8  ;;  %vm171_vm13 = vmor %vm169_vm11, %vm170_vm9  ;;  %v127_v35 = vsel %vm1018_vm12, %v1008_v60, %v123_v24  ;;  %v287_v52 = vpop.f32.mrf.mxu0 }
  0x9f   :  { %v157_v14 = vsel %vm156_vm5, %v858_v62, %v153_v9  ;;  %v166_v15 = vsub.f32 1.0, %v165_v10  ;;  %vm141_vm0 = vmor %vm139_vm14, %vm140_vm10  ;;  %v132_v39 = vsel %vm129_vm2, %v131_v37, %v127_v35  ;;  %v300_v24 = vmax.f32 %v287_v52, 0.0  ;;  %v194_v37 = vld [vmem:[%s1249_s8 + $0x10] sm:$0xff] }
  0xa0   :  { %v162_v16 = vsel %vm159_vm6, %v161_v11, %v157_v14  ;;  %v136_v18 = vsub.f32 1.0, %v135_v12 }
  0xa1   :  { %618 = vperm.xlu1 %837, %v162_v16   ;;  %319 = vperm.xlu0 %835, %v162_v16   ;;  %v167_v19 = vmul.f32 %v860_v7, %v166_v15 }
  0xa2   :  { %v137_v22 = vmul.f32 %v862_v8, %v136_v18  ;;  %v296_v44 = vpop.f32.mrf.mxu2  ;;  %v1046_v45 = vpop.f32.mrf.mxu3 }
  0xa3   :  { %v168_v25 = vadd.f32 %v860_v7, %v167_v19  ;;  %v306_v57 = vmax.f32 %v296_v44, 0.0  ;;  %v299_v23 = vmax.f32 %v1046_v45, 0.0  ;;  %v199_v44 = vld [vmem:[%s1249_s8 + $0x38] sm:$0xff]  ;;  %v196_v45 = vld [vmem:[%s1249_s8 + $0x20] sm:$0xff] }
  0xa4   :  { %v138_v29 = vadd.f32 %v862_v8, %v137_v22 }
  0xa5   :  { %v172_v31 = vsel %vm171_vm13, %v860_v7, %v168_v25 }
  0xa6   :  { %v177_v33 = vsel %vm174_vm15, %v176_v28, %v172_v31  ;;  %v142_v34 = vsel %vm141_vm0, %v862_v8, %v138_v29  ;;  %v290_v60 = vpop.f32.mrf.mxu0 }
  0xa7   :  { %324 = vperm.xlu2 %838, %v177_v33   ;;  %v147_v36 = vsel %vm144_vm1, %v146_v32, %v142_v34  ;;  %v302_v10 = vmax.f32 %v290_v60, 0.0  ;;  %v183_v34 = vld [vmem:[%s1250_s7] sm:$0xff] }
  0xa9   :  { %842 = vset.pattern.permute.xlu1 %v863_v0  ;;  %841 = vset.pattern.permute.xlu0 %v864_v38 }
  0xaa   :  { %614 = vperm.xlu0 %841, %v147_v36   ;;  %309 = vperm.xlu1 %842, %v132_v39   ;;  %v261_v48 = vpop.f32.mrf.mxu3 }
  0xab   :  { %v301_v11 = vmax.f32 %v261_v48, 0.0  ;;  %v189_v48 = vld [vmem:[%s1250_s7 + $0x30] sm:$0xff] }
  0xae   :  { %v293_v5 = vpop.f32.mrf.mxu0 }
  0xaf   :  { %839 = vset.pattern.permute.xlu2 %v864_v38  ;;  %v304_v7 = vmax.f32 %v293_v5, 0.0 }
  0xb0   :  { %622 = vperm.xlu2 %839, %v177_v33  }
  0xb2   :  { %337 = vperm.xlu1 %842, %v192_v40   ;;  %845 = vset.pattern.permute.xlu0 %v863_v0  ;;  %v264_v51 = vpop.f32.mrf.mxu3  ;;  %v185_v40 = vld [vmem:[%s1250_s7 + $0x10] sm:$0xff] }
  0xb3   :  { %v303_v8 = vmax.f32 %v264_v51, 0.0  ;;  %347 = vperm.xlu0 %845, %v194_v37  }
  0xb4   :  { %v1048_v46 = vpop.f32.mrf.mxu1 }
  0xb5   :  { %v601_v26 = vmax.f32 %v1048_v46, 0.0  ;;  %v188_v46 = vld [vmem:[%s1250_s7 + $0x28] sm:$0xff] }
  0xb8   :  { %840 = vset.pattern.permute.xlu2 %v863_v0 }
  0xb9   :  { %314 = vperm.xlu2 %840, %v147_v36  }
  0xba   :  { %352 = vperm.xlu1 %842, %v195_v41   ;;  %v1050_v47 = vpop.f32.mrf.mxu2  ;;  %v193_v41 = vld [vmem:[%s1249_s8 + $0x8] sm:$0xff] }
  0xbb   :  { %v267_v55 = vpop.f32.mrf.mxu3  ;;  %v602_v31 = vmax.f32 %v1050_v47, 0.0  ;;  %372 = vperm.xlu0 %845, %v199_v44   ;;  %v198_v47 = vld [vmem:[%s1249_s8 + $0x30] sm:$0xff] }
  0xbc   :  { %v563_v49 = vpop.f32.mrf.mxu1  ;;  %v305_v56 = vmax.f32 %v267_v55, 0.0 }
  0xbd   :  { %v603_v21 = vmax.f32 %v563_v49, 0.0  ;;  %v190_v49 = vld [vmem:[%s1250_s7 + $0x38] sm:$0xff] }
  0xc1   :  { %843 = vset.pattern.permute.xlu2 %v864_v38 }
  0xc2   :  { %610 = vperm.xlu2 %843, %v132_v39   ;;  %362 = vperm.xlu1 %842, %v197_v42   ;;  %v592_v50 = vpop.f32.mrf.mxu2  ;;  %v184_v39 = vld [vmem:[%s1250_s7 + $0x8] sm:$0xff]  ;;  %v186_v42 = vld [vmem:[%s1250_s7 + $0x18] sm:$0xff] }
  0xc3   :  { %v604_v22 = vmax.f32 %v592_v50, 0.0  ;;  %846 = vset.pattern.permute.xlu0 %v864_v38  ;;  %v191_v38 = vld [vmem:[%s1250_s7 + $0x40] sm:$0xff] }
  0xc4   :  { %v566_v53 = vpop.f32.mrf.mxu1 }
  0xc5   :  { %v605_v6 = vmax.f32 %v566_v53, 0.0 }
  0xca   :  { %377 = vperm.xlu1 %842, %v200_v43   ;;  %844 = vset.pattern.permute.xlu2 %v863_v0  ;;  %v595_v54 = vpop.f32.mrf.mxu2  ;;  %v187_v43 = vld [vmem:[%s1250_s7 + $0x20] sm:$0xff] }
  0xcb   :  { %v606_v9 = vmax.f32 %v595_v54, 0.0  ;;  %342 = vperm.xlu2 %844, %v193_v41  }
  0xcc   :  { %v569_v61 = vpop.f32.mrf.mxu1 }
  0xcd   :  { %v607_v63 = vmax.f32 %v569_v61, 0.0 }
  0xd2   :  { %v598_v62 = vpop.f32.mrf.mxu2 }
  0xd3   :  { %v608_v1 = vmax.f32 %v598_v62, 0.0  ;;  %357 = vperm.xlu2 %844, %v196_v45  }
  0xdb   :  { %367 = vperm.xlu2 %844, %v198_v47  }
 0x101   :  { %v325_v58 = vpop.permute.xlu2 %324 }
 0x102   :  { %v333_v59 = vmul.f32 %v325_v58, %v305_v56  ;;  %v334_v0 = vmul.f32 %v325_v58, %v306_v57 }
 0x104   :  { %420 = vmatpush.msra.mxu3 %v333_v59  ;;  %464 = vmatpush.msra.mxu0 %v334_v0 }
 0x10a   :  { %v623_v2 = vpop.permute.xlu2 %622 }
 0x10b   :  { %v631_v3 = vmul.f32 %v623_v2, %v607_v63  ;;  %v632_v4 = vmul.f32 %v623_v2, %v608_v1 }
 0x10d   :  { %645 = vmatpush.msra.mxu1 %v631_v3  ;;  %689 = vmatpush.msra.mxu2 %v632_v4 }
 0x113   :  { %v619_v12 = vpop.permute.xlu1 %618  ;;  %v320_v13 = vpop.permute.xlu0 %319 }
 0x114   :  { %v629_v14 = vmul.f32 %v619_v12, %v605_v6  ;;  %v630_v15 = vmul.f32 %v619_v12, %v606_v9  ;;  %v331_v16 = vmul.f32 %v320_v13, %v303_v8  ;;  %v332_v17 = vmul.f32 %v320_v13, %v304_v7  ;;  %v315_v18 = vpop.permute.xlu2 %314 }
 0x115   :  { %v329_v19 = vmul.f32 %v315_v18, %v301_v11  ;;  %v330_v20 = vmul.f32 %v315_v18, %v302_v10 }
 0x116   :  { %421 = vmatpush.msra.mxu3 %v331_v16  ;;  %465 = vmatpush.msra.mxu0 %v332_v17 }
 0x117   :  { %646 = vmatpush.msra.mxu1 %v629_v14  ;;  %690 = vmatpush.msra.mxu2 %v630_v15 }
 0x118   :  { %422 = vmatpush.msra.mxu3 %v329_v19  ;;  %466 = vmatpush.msra.mxu0 %v330_v20 }
 0x11c   :  { %v615_v25 = vpop.permute.xlu0 %614  ;;  %v611_v29 = vpop.permute.xlu2 %610 }
 0x11d   :  { %v627_v27 = vmul.f32 %v615_v25, %v603_v21  ;;  %v628_v28 = vmul.f32 %v615_v25, %v604_v22  ;;  %v310_v30 = vpop.permute.xlu1 %309  ;;  %v625_v35 = vmul.f32 %v611_v29, %v601_v26  ;;  %v626_v36 = vmul.f32 %v611_v29, %v602_v31 }
 0x11e   :  { %v327_v32 = vmul.f32 %v310_v30, %v299_v23  ;;  %v328_v33 = vmul.f32 %v310_v30, %v300_v24 }
 0x11f   :  { %647 = vmatpush.msra.mxu1 %v627_v27  ;;  %691 = vmatpush.msra.mxu2 %v628_v28 }
 0x120   :  { %423 = vmatpush.msra.mxu3 %v327_v32  ;;  %467 = vmatpush.msra.mxu0 %v328_v33 }
 0x121   :  { %762 = vmatmul.msk.f32.vlgmr.msra.gmra.mxu3 %vm380_vm3, %v183_v34  ;;  %771 = vmatmul.msk.f32.vlgmr.msra.gmra.mxu0 %vm380_vm3, %v183_v34 }
 0x122   :  { %648 = vmatpush.msra.mxu1 %v625_v35  ;;  %692 = vmatpush.msra.mxu2 %v626_v36 }
 0x123   :  { %793 = vmatmul.msk.f32.vlgmr.msra.gmra.mxu1 %vm380_vm3, %v183_v34  ;;  %802 = vmatmul.msk.f32.vlgmr.msra.gmra.mxu2 %vm380_vm3, %v183_v34 }
 0x125   :  { %v338_v50 = vpop.permute.xlu1 %337  ;;  %v343_v56 = vpop.permute.xlu2 %342 }
 0x126   :  { %v348_v1 = vpop.permute.xlu0 %347 }
 0x129   :  { %763 = vmatmul.msk.f32.gmra.mxu3 %vm380_vm3, %v184_v39  ;;  %772 = vmatmul.msk.f32.gmra.mxu0 %vm380_vm3, %v184_v39 }
 0x12b   :  { %794 = vmatmul.msk.f32.gmra.mxu1 %vm380_vm3, %v184_v39  ;;  %803 = vmatmul.msk.f32.gmra.mxu2 %vm380_vm3, %v184_v39 }
 0x12d   :  { %v353_v10 = vpop.permute.xlu1 %352  ;;  %v358_v19 = vpop.permute.xlu2 %357 }
 0x12e   :  { %v373_v47 = vpop.permute.xlu0 %372 }
 0x131   :  { %764 = vmatmul.msk.f32.gmra.mxu3 %vm380_vm3, %v185_v40  ;;  %773 = vmatmul.msk.f32.gmra.mxu0 %vm380_vm3, %v185_v40 }
 0x133   :  { %795 = vmatmul.msk.f32.gmra.mxu1 %vm380_vm3, %v185_v40  ;;  %804 = vmatmul.msk.f32.gmra.mxu2 %vm380_vm3, %v185_v40 }
 0x135   :  { %v363_v28 = vpop.permute.xlu1 %362  ;;  %v368_v37 = vpop.permute.xlu2 %367 }
 0x139   :  { %765 = vmatmul.msk.f32.gmra.mxu3 %vm380_vm3, %v186_v42  ;;  %774 = vmatmul.msk.f32.gmra.mxu0 %vm380_vm3, %v186_v42 }
 0x13b   :  { %796 = vmatmul.msk.f32.gmra.mxu1 %vm380_vm3, %v186_v42  ;;  %805 = vmatmul.msk.f32.gmra.mxu2 %vm380_vm3, %v186_v42 }
 0x141   :  { %766 = vmatmul.msk.f32.gmra.mxu3 %vm380_vm3, %v187_v43  ;;  %775 = vmatmul.msk.f32.gmra.mxu0 %vm380_vm3, %v187_v43 }
 0x143   :  { %797 = vmatmul.msk.f32.gmra.mxu1 %vm380_vm3, %v187_v43  ;;  %806 = vmatmul.msk.f32.gmra.mxu2 %vm380_vm3, %v187_v43 }
 0x149   :  { %767 = vmatmul.msk.f32.gmra.mxu3 %vm380_vm3, %v188_v46  ;;  %776 = vmatmul.msk.f32.gmra.mxu0 %vm380_vm3, %v188_v46 }
 0x14b   :  { %798 = vmatmul.msk.f32.gmra.mxu1 %vm380_vm3, %v188_v46  ;;  %807 = vmatmul.msk.f32.gmra.mxu2 %vm380_vm3, %v188_v46 }
 0x151   :  { %768 = vmatmul.msk.f32.gmra.mxu3 %vm380_vm3, %v189_v48  ;;  %777 = vmatmul.msk.f32.gmra.mxu0 %vm380_vm3, %v189_v48 }
 0x153   :  { %799 = vmatmul.msk.f32.gmra.mxu1 %vm380_vm3, %v189_v48  ;;  %808 = vmatmul.msk.f32.gmra.mxu2 %vm380_vm3, %v189_v48 }
 0x159   :  { %769 = vmatmul.msk.f32.gmra.mxu3 %vm380_vm3, %v190_v49  ;;  %778 = vmatmul.msk.f32.gmra.mxu0 %vm380_vm3, %v190_v49 }
 0x15b   :  { %800 = vmatmul.msk.f32.gmra.mxu1 %vm380_vm3, %v190_v49  ;;  %809 = vmatmul.msk.f32.gmra.mxu2 %vm380_vm3, %v190_v49 }
 0x161   :  { %770 = vmatmul.msk.f32.gmra.mxu3 %vm380_vm3, %v191_v38  ;;  %779 = vmatmul.msk.f32.gmra.mxu0 %vm380_vm3, %v191_v38 }
 0x163   :  { %801 = vmatmul.msk.f32.gmra.mxu1 %vm380_vm3, %v191_v38  ;;  %810 = vmatmul.msk.f32.gmra.mxu2 %vm380_vm3, %v191_v38 }
 0x19e   :  { %v469_v51 = vpop.f32.mrf.mxu0 }
 0x19f   :  { %v470_v52 = vadd.f32 %v469_v51, %v338_v50 }
 0x1a0   :  { %v650_v53 = vpop.f32.mrf.mxu1 }
 0x1a1   :  { %497 = vst [vmem:[%s1251_s9 + $0x8] sm:$0xff] %v470_v52  ;;  %v651_v54 = vadd.f32 %v650_v53, %v338_v50 }
 0x1a3   :  { %811 = vst [vmem:[%s1251_s9 + $0x90] sm:$0xff] %v651_v54 }
 0x1a4   :  { %v425_v55 = vpop.f32.mrf.mxu3 }
 0x1a5   :  { %v426_v57 = vadd.f32 %v425_v55, %v338_v50  ;;  %v378_v55 = vpop.permute.xlu1 %377 }
 0x1a6   :  { %v472_v58 = vpop.f32.mrf.mxu0  ;;  %v694_v59 = vpop.f32.mrf.mxu2 }
 0x1a7   :  { %496 = vst [vmem:[%s1251_s9] sm:$0xff] %v426_v57  ;;  %v695_v0 = vadd.f32 %v694_v59, %v338_v50  ;;  %v473_v60 = vadd.f32 %v472_v58, %v343_v56 }
 0x1a8   :  { %v653_v61 = vpop.f32.mrf.mxu1 }
 0x1a9   :  { %812 = vst [vmem:[%s1251_s9 + $0x98] sm:$0xff] %v695_v0  ;;  %v654_v62 = vadd.f32 %v653_v61, %v343_v56 }
 0x1aa   :  { %499 = vst [vmem:[%s1251_s9 + $0x18] sm:$0xff] %v473_v60 }
 0x1ab   :  { %813 = vst [vmem:[%s1251_s9 + $0xa0] sm:$0xff] %v654_v62 }
 0x1ac   :  { %v428_v63 = vpop.f32.mrf.mxu3 }
 0x1ad   :  { %v429_v2 = vadd.f32 %v428_v63, %v343_v56 }
 0x1ae   :  { %v475_v3 = vpop.f32.mrf.mxu0  ;;  %v697_v4 = vpop.f32.mrf.mxu2 }
 0x1af   :  { %498 = vst [vmem:[%s1251_s9 + $0x10] sm:$0xff] %v429_v2  ;;  %v698_v5 = vadd.f32 %v697_v4, %v343_v56  ;;  %v476_v6 = vadd.f32 %v475_v3, %v348_v1 }
 0x1b0   :  { %v656_v7 = vpop.f32.mrf.mxu1 }
 0x1b1   :  { %814 = vst [vmem:[%s1251_s9 + $0xa8] sm:$0xff] %v698_v5  ;;  %v657_v8 = vadd.f32 %v656_v7, %v348_v1 }
 0x1b2   :  { %501 = vst [vmem:[%s1251_s9 + $0x28] sm:$0xff] %v476_v6 }
 0x1b3   :  { %815 = vst [vmem:[%s1251_s9 + $0xb0] sm:$0xff] %v657_v8 }
 0x1b4   :  { %v431_v9 = vpop.f32.mrf.mxu3 }
 0x1b5   :  { %v432_v11 = vadd.f32 %v431_v9, %v348_v1 }
 0x1b6   :  { %v478_v12 = vpop.f32.mrf.mxu0  ;;  %v700_v13 = vpop.f32.mrf.mxu2 }
 0x1b7   :  { %v479_v14 = vadd.f32 %v478_v12, %v353_v10  ;;  %500 = vst [vmem:[%s1251_s9 + $0x20] sm:$0xff] %v432_v11  ;;  %v701_v15 = vadd.f32 %v700_v13, %v348_v1 }
 0x1b8   :  { %v659_v16 = vpop.f32.mrf.mxu1 }
 0x1b9   :  { %503 = vst [vmem:[%s1251_s9 + $0x38] sm:$0xff] %v479_v14  ;;  %v660_v17 = vadd.f32 %v659_v16, %v353_v10 }
 0x1ba   :  { %816 = vst [vmem:[%s1251_s9 + $0xb8] sm:$0xff] %v701_v15 }
 0x1bb   :  { %817 = vst [vmem:[%s1251_s9 + $0xc0] sm:$0xff] %v660_v17 }
 0x1bc   :  { %v434_v18 = vpop.f32.mrf.mxu3 }
 0x1bd   :  { %v435_v20 = vadd.f32 %v434_v18, %v353_v10 }
 0x1be   :  { %v481_v21 = vpop.f32.mrf.mxu0  ;;  %v703_v22 = vpop.f32.mrf.mxu2 }
 0x1bf   :  { %502 = vst [vmem:[%s1251_s9 + $0x30] sm:$0xff] %v435_v20  ;;  %v704_v23 = vadd.f32 %v703_v22, %v353_v10  ;;  %v482_v24 = vadd.f32 %v481_v21, %v358_v19 }
 0x1c0   :  { %v662_v25 = vpop.f32.mrf.mxu1 }
 0x1c1   :  { %818 = vst [vmem:[%s1251_s9 + $0xc8] sm:$0xff] %v704_v23  ;;  %v663_v26 = vadd.f32 %v662_v25, %v358_v19 }
 0x1c2   :  { %505 = vst [vmem:[%s1251_s9 + $0x48] sm:$0xff] %v482_v24 }
 0x1c3   :  { %819 = vst [vmem:[%s1251_s9 + $0xd0] sm:$0xff] %v663_v26 }
 0x1c4   :  { %v437_v27 = vpop.f32.mrf.mxu3 }
 0x1c5   :  { %v438_v29 = vadd.f32 %v437_v27, %v358_v19 }
 0x1c6   :  { %v484_v30 = vpop.f32.mrf.mxu0  ;;  %v706_v31 = vpop.f32.mrf.mxu2 }
 0x1c7   :  { %v485_v32 = vadd.f32 %v484_v30, %v363_v28  ;;  %504 = vst [vmem:[%s1251_s9 + $0x40] sm:$0xff] %v438_v29  ;;  %v707_v33 = vadd.f32 %v706_v31, %v358_v19 }
 0x1c8   :  { %v665_v34 = vpop.f32.mrf.mxu1 }
 0x1c9   :  { %507 = vst [vmem:[%s1251_s9 + $0x58] sm:$0xff] %v485_v32  ;;  %v666_v35 = vadd.f32 %v665_v34, %v363_v28 }
 0x1ca   :  { %820 = vst [vmem:[%s1251_s9 + $0xd8] sm:$0xff] %v707_v33 }
 0x1cb   :  { %821 = vst [vmem:[%s1251_s9 + $0xe0] sm:$0xff] %v666_v35 }
 0x1cc   :  { %v440_v36 = vpop.f32.mrf.mxu3 }
 0x1cd   :  { %v441_v39 = vadd.f32 %v440_v36, %v363_v28 }
 0x1ce   :  { %v487_v40 = vpop.f32.mrf.mxu0  ;;  %v709_v41 = vpop.f32.mrf.mxu2 }
 0x1cf   :  { %506 = vst [vmem:[%s1251_s9 + $0x50] sm:$0xff] %v441_v39  ;;  %v710_v42 = vadd.f32 %v709_v41, %v363_v28  ;;  %v488_v43 = vadd.f32 %v487_v40, %v368_v37 }
 0x1d0   :  { %v668_v44 = vpop.f32.mrf.mxu1 }
 0x1d1   :  { %822 = vst [vmem:[%s1251_s9 + $0xe8] sm:$0xff] %v710_v42  ;;  %v669_v45 = vadd.f32 %v668_v44, %v368_v37 }
 0x1d2   :  { %509 = vst [vmem:[%s1251_s9 + $0x68] sm:$0xff] %v488_v43 }
 0x1d3   :  { %823 = vst [vmem:[%s1251_s9 + $0xf0] sm:$0xff] %v669_v45 }
 0x1d4   :  { %v443_v46 = vpop.f32.mrf.mxu3 }
 0x1d5   :  { %v444_v48 = vadd.f32 %v443_v46, %v368_v37 }
 0x1d6   :  { %v490_v49 = vpop.f32.mrf.mxu0  ;;  %v712_v38 = vpop.f32.mrf.mxu2 }
 0x1d7   :  { %508 = vst [vmem:[%s1251_s9 + $0x60] sm:$0xff] %v444_v48  ;;  %v713_v50 = vadd.f32 %v712_v38, %v368_v37  ;;  %v491_v51 = vadd.f32 %v490_v49, %v373_v47 }
 0x1d8   :  { %v671_v52 = vpop.f32.mrf.mxu1 }
 0x1d9   :  { %824 = vst [vmem:[%s1251_s9 + $0xf8] sm:$0xff] %v713_v50  ;;  %v672_v53 = vadd.f32 %v671_v52, %v373_v47 }
 0x1da   :  { %511 = vst [vmem:[%s1251_s9 + $0x78] sm:$0xff] %v491_v51 }
 0x1db   :  { %825 = vst [vmem:[%s1251_s9 + $0x100] sm:$0xff] %v672_v53 }
 0x1dc   :  { %v446_v54 = vpop.f32.mrf.mxu3 }
 0x1dd   :  { %v447_v56 = vadd.f32 %v446_v54, %v373_v47 }
 0x1de   :  { %v493_v57 = vpop.f32.mrf.mxu0  ;;  %v715_v58 = vpop.f32.mrf.mxu2 }
 0x1df   :  { %v494_v59 = vadd.f32 %v493_v57, %v378_v55  ;;  %510 = vst [vmem:[%s1251_s9 + $0x70] sm:$0xff] %v447_v56  ;;  %v716_v0 = vadd.f32 %v715_v58, %v373_v47 }
 0x1e0   :  { %v674_v60 = vpop.f32.mrf.mxu1 }
 0x1e1   :  { %513 = vst [vmem:[%s1251_s9 + $0x88] sm:$0xff] %v494_v59  ;;  %v675_v61 = vadd.f32 %v674_v60, %v378_v55 }
 0x1e2   :  { %826 = vst [vmem:[%s1251_s9 + $0x108] sm:$0xff] %v716_v0 }
 0x1e3   :  { %827 = vst [vmem:[%s1251_s9 + $0x110] sm:$0xff] %v675_v61 }
 0x1e4   :  { %v449_v62 = vpop.f32.mrf.mxu3 }
 0x1e5   :  { %v450_v63 = vadd.f32 %v449_v62, %v378_v55 }
 0x1e6   :  { %v718_v1 = vpop.f32.mrf.mxu2 }
 0x1e7   :  { %512 = vst [vmem:[%s1251_s9 + $0x80] sm:$0xff] %v450_v63  ;;  %v719_v2 = vadd.f32 %v718_v1, %v378_v55 }
 0x1e9   :  { %828 = vst [vmem:[%s1251_s9 + $0x118] sm:$0xff] %v719_v2 }

</bundles_post_ra>
